<compile_context>
chip_gen: v7x
topology: tpu7x:2x2x1
jax: 0.10.0
libtpu: 0.0.40
codegen_flags: <defaults>
</compile_context>

<pallas_src>
import jax
import jax.numpy as jnp
from jax.experimental import pallas as pl
from jax.experimental.pallas import tpu as pltpu


def _make_fused_kernel(B, S):
    """Kernel: o[b, 0:S] = o[b, S:2S] = x[b] @ w.T   (laid out as (B*2S, N))."""

    def kernel(x_ref, w_ref, o_ref):
        # x_ref: (B*S, D)   w_ref: (N, D)   o_ref: (B*2S, N)
        prod = jax.lax.dot_general(
            x_ref[...],
            w_ref[...],
            dimension_numbers=(((1,), (1,)), ((), ())),  # contract D with D
            preferred_element_type=jnp.float32,
            precision=jax.lax.Precision.HIGHEST,
        ).astype(o_ref.dtype)  # (B*S, N)

        # Fused cat((x, x), dim=1): duplicate each batch's S-row slab.
        # B is a tiny static constant -> static unrolled stores.
        for b in range(B):
            blk = prod[b * S:(b + 1) * S, :]
            base = b * 2 * S
            o_ref[base:base + S, :] = blk
            o_ref[base + S:base + 2 * S, :] = blk

    return kernel


def model_forward(x, weight):
    """x: (B, S, D) f32, weight: (N, D) f32 -> flat (B*2S*N,) f32."""
    B, S, D = x.shape
    N, Dw = weight.shape
    assert D == Dw
    M = B * S

    x2d = x.reshape(M, D)  # collapse leading dims: metadata-only, free

    cost = pl.CostEstimate(
        flops=2 * M * D * N,
        transcendentals=0,
        bytes_accessed=(M * D + N * D + 2 * M * N) * 4,
    )

    out2d = pl.pallas_call(
        _make_fused_kernel(B, S),
        out_shape=jax.ShapeDtypeStruct((B * 2 * S, N), jnp.float32),
        grid_spec=pltpu.PrefetchScalarGridSpec(
            num_scalar_prefetch=0,
            grid=(1,),
            in_specs=[
                pl.BlockSpec((M, D), lambda i: (0, 0)),   # full array == block
                pl.BlockSpec((N, D), lambda i: (0, 0)),   # weight, as-is (N, D)
            ],
            out_specs=pl.BlockSpec((B * 2 * S, N), lambda i: (0, 0)),
        ),
        compiler_params=pltpu.CompilerParams(
            dimension_semantics=("arbitrary",),
        ),
        cost_estimate=cost,
    )(x2d, weight)

    # x.view(-1): contiguous flatten of (B*2S, N) -> metadata-only.
    return out2d.reshape(-1)


if __name__ == "__main__":
    key = jax.random.PRNGKey(0)
    kx, kw = jax.random.split(key)
    x = jax.random.normal(kx, (2, 3, 4), dtype=jnp.float32)
    weight = jax.random.normal(kw, (5, 4), dtype=jnp.float32)

    fwd = jax.jit(model_forward)
    out = fwd(x, weight)
    jax.block_until_ready(out)

    # sanity check against plain-JAX reference of the same semantics
    xc = jnp.concatenate((x, x), axis=1)                         # (2, 6, 4)
    ref = jnp.einsum(
        "bsd,nd->bsn", xc, weight, precision=jax.lax.Precision.HIGHEST
    ).reshape(-1)                                                # (60,)
    assert out.shape == (2 * 6 * 5,)
    assert jnp.allclose(out, ref, atol=1e-5, rtol=1e-5)

    print("KERNEL_OK")
</pallas_src>

<mosaic_0001>
module attributes {stable_mosaic.version = 11 : i64} {
  func.func @kernel(%arg0: i32, %arg1: memref<6x4xf32, #tpu.memory_space<vmem>>, %arg2: memref<5x4xf32, #tpu.memory_space<vmem>>, %arg3: memref<12x5xf32, #tpu.memory_space<vmem>>) attributes {dimension_semantics = [#tpu.dimension_semantics<arbitrary>], iteration_bounds = array<i64: 1>, scalar_prefetch = 0 : i64, scratch_operands = 0 : i64, tpu.core_type = #tpu.core_type<tc>, window_params = [{pipeline_mode = #tpu.pipeline_mode<synchronous>, transform_indices = @transform_0, window_bounds = array<i64: 6, 4>}, {pipeline_mode = #tpu.pipeline_mode<synchronous>, transform_indices = @transform_1, window_bounds = array<i64: 5, 4>}, {pipeline_mode = #tpu.pipeline_mode<synchronous>, transform_indices = @transform_2, window_bounds = array<i64: 12, 5>}]} {
    %c0 = arith.constant 0 : index
    %c0_0 = arith.constant 0 : index
    %0 = vector.load %arg1[%c0, %c0_0] : memref<6x4xf32, #tpu.memory_space<vmem>>, vector<6x4xf32>
    %c0_1 = arith.constant 0 : index
    %c0_2 = arith.constant 0 : index
    %1 = vector.load %arg2[%c0_1, %c0_2] : memref<5x4xf32, #tpu.memory_space<vmem>>, vector<5x4xf32>
    %cst = arith.constant dense<0.000000e+00> : vector<6x5xf32>
    %2 = tpu.matmul %0, %1, %cst {dimension_numbers = #tpu.dot_dimension_numbers<[1], [1], [0], [0], [0, 0, 1, 0], [], []>, precision = #tpu.contract_precision<fp32>} : vector<6x4xf32>, vector<5x4xf32>, vector<6x5xf32> -> vector<6x5xf32>
    %3 = vector.extract_strided_slice %2 {offsets = [0, 0], sizes = [3, 5], strides = [1, 1]} : vector<6x5xf32> to vector<3x5xf32>
    %c0_3 = arith.constant 0 : index
    %c0_4 = arith.constant 0 : index
    %4 = vector.load %arg3[%c0_3, %c0_4] : memref<12x5xf32, #tpu.memory_space<vmem>>, vector<3x5xf32>
    tpu.vector_store %arg3[%c0_3, %c0_4], %3 {strides = array<i32>} : memref<12x5xf32, #tpu.memory_space<vmem>>, vector<3x5xf32>,
    %c3 = arith.constant 3 : index
    %c0_5 = arith.constant 0 : index
    %5 = vector.load %arg3[%c3, %c0_5] : memref<12x5xf32, #tpu.memory_space<vmem>>, vector<3x5xf32>
    tpu.vector_store %arg3[%c3, %c0_5], %3 {strides = array<i32>} : memref<12x5xf32, #tpu.memory_space<vmem>>, vector<3x5xf32>,
    %6 = vector.extract_strided_slice %2 {offsets = [3, 0], sizes = [3, 5], strides = [1, 1]} : vector<6x5xf32> to vector<3x5xf32>
    %c6 = arith.constant 6 : index
    %c0_6 = arith.constant 0 : index
    %7 = vector.load %arg3[%c6, %c0_6] : memref<12x5xf32, #tpu.memory_space<vmem>>, vector<3x5xf32>
    tpu.vector_store %arg3[%c6, %c0_6], %6 {strides = array<i32>} : memref<12x5xf32, #tpu.memory_space<vmem>>, vector<3x5xf32>,
    %c9 = arith.constant 9 : index
    %c0_7 = arith.constant 0 : index
    %8 = vector.load %arg3[%c9, %c0_7] : memref<12x5xf32, #tpu.memory_space<vmem>>, vector<3x5xf32>
    tpu.vector_store %arg3[%c9, %c0_7], %6 {strides = array<i32>} : memref<12x5xf32, #tpu.memory_space<vmem>>, vector<3x5xf32>,
    return
  }
  func.func @transform_0(%arg0: i32) -> (i32, i32) {
    %c0_i32 = arith.constant 0 : i32
    %c0_i32_0 = arith.constant 0 : i32
    %c0_i32_1 = arith.constant 0 : i32
    return %c0_i32, %c0_i32_0 : i32, i32
  }
  func.func @transform_1(%arg0: i32) -> (i32, i32) {
    %c0_i32 = arith.constant 0 : i32
    %c0_i32_0 = arith.constant 0 : i32
    %c0_i32_1 = arith.constant 0 : i32
    return %c0_i32, %c0_i32_0 : i32, i32
  }
  func.func @transform_2(%arg0: i32) -> (i32, i32) {
    %c0_i32 = arith.constant 0 : i32
    %c0_i32_0 = arith.constant 0 : i32
    %c0_i32_1 = arith.constant 0 : i32
    return %c0_i32, %c0_i32_0 : i32, i32
  }
}

</mosaic_0001>

<bundles_post_ra>
// kernel: model_forward.1
= control target key start
LH: loop header
LB: loop body
LE: loop exit
PB: predicated region body
PF: predicated region fallthrough
CT: control target
= control target key end

     0   :  { %vm13_vm0 = vcmask 31744   ;;  %v529_v0 = vmov 0.0   ;;  %vm530_vm1 = vmmov 0   ;;  %vm466_vm2 = vcmask 34816   ;;  %s570_s1 = inlined_call_operand.vmem [shape: f32[5,4], index: 1, kind: input, shape index: {}]   ;;  %s571_s0 = inlined_call_operand.vmem [shape: f32[6,4], index: 0, kind: input, shape index: {}]   ;;  %s572_s2 = inlined_call_operand.vmem [shape: f32[12,5], index: 2, kind: output, shape index: {}]  }
   0x1   :  { %503 = vmatprep.subr.mxu0 %v529_v0  ;;  %v12_v1 = vld [vmem:[%s570_s1] sm:$0x1f]  ;;  %488 = vmatprep.subr.mxu1 %v529_v0  ;;  %vm469_vm3 = vcmask 37891  }
   0x2   :  { %v11_v2 = vld [vmem:[%s571_s0] sm:$0x3f]  ;;  %v18_v3 = vsel %vm13_vm0, %v12_v1, 0  ;;  %505 = vmatprep.mubr.msk.f32.mxu0 %vm530_vm1, %v529_v0  ;;  %490 = vmatprep.mubr.msk.f32.mxu1 %vm530_vm1, %v529_v0 }
   0x3   :  { %v15_v4 = vsel %vm13_vm0, %v11_v2, 0  ;;  %v21_v5 = vand.u32 4294901760, %v18_v3 }
   0x4   :  { %v86_v6 = vand.u32 4294901760, %v15_v4 }
   0x5   :  { %v98_v7 = vsub.f32 %v18_v3, %v21_v5  ;;  %504 = vmatpush3.xpose.msra.mxu0 %v21_v5  ;;  %489 = vmatpush3.xpose.msra.mxu1 %v21_v5 }
   0x6   :  { %v87_v8 = vsub.f32 %v15_v4, %v86_v6  ;;  %493 = vmatprep.subr.mxu1 %v529_v0  ;;  %508 = vmatprep.subr.mxu0 %v529_v0 }
   0x7   :  { %v99_v10 = vand.u32 4294901760, %v98_v7 }
   0x8   :  { %v88_v9 = vand.u32 4294901760, %v87_v8 }
   0x9   :  { %v100_v12 = vsub.f32 %v98_v7, %v99_v10 }
   0xa   :  { %506 = vmatmul.mubr.f32.vlgmr.msra.gmra.mrb[0].mxu0 %v88_v9  ;;  %v89_v11 = vsub.f32 %v87_v8, %v88_v9 }
   0xb   :  { %509 = vmatpush3.xpose.msra.mxu0 %v99_v10  ;;  %510 = vmatprep.mubr.msk.f32.mxu0 %vm530_vm1, %v529_v0  ;;  %v101_v14 = vand.u32 4294901760, %v100_v12 }
   0xc   :  { %v90_v13 = vand.u32 4294901760, %v89_v11  ;;  %513 = vmatprep.subr.mxu0 %v529_v0 }
   0xe   :  { %491 = vmatmul.mubr.f32.vlgmr.msra.gmra.mrb[0].mxu1 %v90_v13 }
   0xf   :  { %494 = vmatpush3.xpose.msra.mxu1 %v101_v14  ;;  %495 = vmatprep.mubr.msk.f32.mxu1 %vm530_vm1, %v529_v0 }
  0x10   :  { %498 = vmatprep.subr.mxu1 %v529_v0 }
  0x12   :  { %511 = vmatmul.mubr.f32.vlgmr.msra.gmra.mrb[0].mxu0 %v86_v6 }
  0x13   :  { %514 = vmatpush3.xpose.msra.mxu0 %v21_v5  ;;  %515 = vmatprep.mubr.msk.f32.mxu0 %vm530_vm1, %v529_v0 }
  0x16   :  { %496 = vmatmul.mubr.f32.vlgmr.msra.gmra.mrb[0].mxu1 %v86_v6 }
  0x17   :  { %499 = vmatpush3.xpose.msra.mxu1 %v98_v7  ;;  %500 = vmatprep.mubr.msk.f32.mxu1 %vm530_vm1, %v529_v0 }
  0x1a   :  { %516 = vmatmul.mubr.f32.vlgmr.msra.gmra.mrb[0].mxu0 %v86_v6 }
  0x1e   :  { %501 = vmatmul.mubr.f32.vlgmr.msra.gmra.mrb[0].mxu1 %v87_v8 }
  0xed   :  { %v462_v15 = vpop.f32.mrb[0].mxu0 }
  0xee   :  { %v517_v16 = vpop.f32.mrb[1].mxu0 }
  0xf1   :  { %v242_v17 = vpop.f32.mrb[0].mxu1 }
  0xf2   :  { %v518_v18 = vadd.f32 %v462_v15, %v242_v17  ;;  %v502_v19 = vpop.f32.mrb[1].mxu1 }
  0xf4   :  { %467 = vst.msk [vmem:[%s572_s2] sm:$0x7] %vm466_vm2, %v518_v18  ;;  %468 = vst.msk [vmem:[%s572_s2 + $0x3] sm:$0x7] %vm466_vm2, %v518_v18 }
  0xf5   :  { %470 = vst.msk [vmem:[%s572_s2 + $0x3] sm:$0x38] %vm469_vm3, %v518_v18  ;;  %471 = vst.msk [vmem:[%s572_s2 + $0x6] sm:$0x38] %vm469_vm3, %v518_v18 }

</bundles_post_ra>
